<compile_context>
chip_gen: v6e
topology: v6e:2x2x1
jax: 0.10.0
libtpu: 0.0.40
codegen_flags: <defaults>
</compile_context>

<pallas_src>
import functools

import jax
import jax.numpy as jnp
from jax.experimental import pallas as pl
from jax.experimental.pallas import tpu as pltpu


def _se_kernel(x_ref, w1t_ref, w2_ref, o_ref, *, inv_hw):
    # x_ref/o_ref: (1, C, HW) VMEM tile for one batch element.
    # w1t_ref: (C, Cr) == fc1.weight.T      (Cr = C // reduction)
    # w2_ref : (C, Cr) == fc2.weight
    x = x_ref[0].astype(jnp.float32)                           # (C, HW)

    # Squeeze: global average pool over the spatial (lane) axis.
    pooled = jnp.sum(x, axis=-1, keepdims=True) * inv_hw       # (C, 1)

    # Excite: fc1 + ReLU.  h[j] = sum_c W1[j, c] * pooled[c]
    h = jnp.sum(w1t_ref[...].astype(jnp.float32) * pooled,
                axis=0, keepdims=True)                         # (1, Cr)
    h = jnp.maximum(h, 0.0)

    # fc2 + sigmoid.  gate[c] = sigmoid(sum_j W2[c, j] * h[j])
    gate = jnp.sum(w2_ref[...].astype(jnp.float32) * h,
                   axis=-1, keepdims=True)                     # (C, 1)
    gate = jax.nn.sigmoid(gate)

    # Scale: per-channel rescale of the full spatial slab.
    o_ref[0] = (x * gate).astype(o_ref.dtype)


def se_block(x, w1, w2):
    """SEBlock forward.

    x : (B, C, H, W)
    w1: (C//r, C)  == fc1.weight
    w2: (C, C//r)  == fc2.weight
    """
    B, C, H, W = x.shape
    HW = H * W
    Cr = w1.shape[0]
    assert w1.shape == (Cr, C) and w2.shape == (C, Cr)

    x3 = x.reshape(B, C, HW)          # contiguous reshape: metadata only
    w1t = jnp.transpose(w1)           # (C, Cr)

    kernel = functools.partial(_se_kernel, inv_hw=1.0 / HW)

    out3 = pl.pallas_call(
        kernel,
        out_shape=jax.ShapeDtypeStruct((B, C, HW), x.dtype),
        grid_spec=pltpu.PrefetchScalarGridSpec(
            num_scalar_prefetch=0,
            grid=(B,),
            in_specs=[
                pl.BlockSpec((1, C, HW), lambda b: (b, 0, 0)),  # one batch slab
                pl.BlockSpec((C, Cr), lambda b: (0, 0)),        # fc1.weight.T
                pl.BlockSpec((C, Cr), lambda b: (0, 0)),        # fc2.weight
            ],
            out_specs=pl.BlockSpec((1, C, HW), lambda b: (b, 0, 0)),
        ),
        compiler_params=pltpu.CompilerParams(
            dimension_semantics=("parallel",)),
    )(x3, w1t, w2)

    return out3.reshape(B, C, H, W)


if __name__ == "__main__":
    key = jax.random.PRNGKey(0)
    k1, k2, k3 = jax.random.split(key, 3)

    # Small shapes consistent with the module: reduction=16 requires C >= 16.
    B, C, H, W = 2, 64, 16, 16
    reduction = 16
    Cr = C // reduction

    x = jax.random.normal(k1, (B, C, H, W), dtype=jnp.float32)
    w1 = jax.random.normal(k2, (Cr, C), dtype=jnp.float32) * 0.1   # fc1.weight
    w2 = jax.random.normal(k3, (C, Cr), dtype=jnp.float32) * 0.1   # fc2.weight

    out = jax.block_until_ready(se_block(x, w1, w2))

    # Pure-JAX reference of the PyTorch forward.
    pooled = jnp.mean(x, axis=(2, 3))                      # (B, C)
    h = jnp.maximum(pooled @ w1.T, 0.0)                    # (B, Cr)
    gate = jax.nn.sigmoid(h @ w2.T)                        # (B, C)
    ref = x * gate[:, :, None, None]

    assert out.shape == x.shape and out.dtype == x.dtype
    assert jnp.allclose(out, ref, atol=1e-5, rtol=1e-5), float(
        jnp.max(jnp.abs(out - ref)))
    print("KERNEL_OK")
</pallas_src>

<mosaic_0001>
module attributes {stable_mosaic.version = 11 : i64} {
  func.func @_se_kernel(%arg0: i32, %arg1: memref<1x64x256xf32, #tpu.memory_space<vmem>>, %arg2: memref<64x4xf32, #tpu.memory_space<vmem>>, %arg3: memref<64x4xf32, #tpu.memory_space<vmem>>, %arg4: memref<1x64x256xf32, #tpu.memory_space<vmem>>) attributes {dimension_semantics = [#tpu.dimension_semantics<parallel>], iteration_bounds = array<i64: 2>, scalar_prefetch = 0 : i64, scratch_operands = 0 : i64, tpu.core_type = #tpu.core_type<tc>, window_params = [{transform_indices = @transform_0, window_bounds = array<i64: 1, 64, 256>}, {pipeline_mode = #tpu.pipeline_mode<synchronous>, transform_indices = @transform_1, window_bounds = array<i64: 64, 4>}, {pipeline_mode = #tpu.pipeline_mode<synchronous>, transform_indices = @transform_2, window_bounds = array<i64: 64, 4>}, {transform_indices = @transform_3, window_bounds = array<i64: 1, 64, 256>}]} {
    %c0 = arith.constant 0 : index
    %c0_0 = arith.constant 0 : index
    %c0_1 = arith.constant 0 : index
    %0 = vector.load %arg1[%c0, %c0_0, %c0_1] : memref<1x64x256xf32, #tpu.memory_space<vmem>>, vector<1x64x256xf32>
    %1 = vector.shape_cast %0 : vector<1x64x256xf32> to vector<64x256xf32>
    %cst = arith.constant dense<0.000000e+00> : vector<64xf32>
    %2 = vector.multi_reduction <add>, %1, %cst [1] : vector<64x256xf32> to vector<64xf32>
    %3 = vector.shape_cast %2 : vector<64xf32> to vector<64x1xf32>
    %cst_2 = arith.constant 3.906250e-03 : f32
    %4 = vector.broadcast %cst_2 : f32 to vector<64x1xf32>
    %5 = arith.mulf %3, %4 : vector<64x1xf32>
    %c0_3 = arith.constant 0 : index
    %c0_4 = arith.constant 0 : index
    %6 = vector.load %arg2[%c0_3, %c0_4] : memref<64x4xf32, #tpu.memory_space<vmem>>, vector<64x4xf32>
    %7 = vector.broadcast %5 : vector<64x1xf32> to vector<64x4xf32>
    %8 = arith.mulf %6, %7 : vector<64x4xf32>
    %cst_5 = arith.constant dense<0.000000e+00> : vector<4xf32>
    %9 = vector.multi_reduction <add>, %8, %cst_5 [0] : vector<64x4xf32> to vector<4xf32>
    %10 = vector.shape_cast %9 : vector<4xf32> to vector<1x4xf32>
    %cst_6 = arith.constant 0.000000e+00 : f32
    %11 = vector.broadcast %cst_6 : f32 to vector<1x4xf32>
    %12 = arith.maximumf %10, %11 : vector<1x4xf32>
    %c0_7 = arith.constant 0 : index
    %c0_8 = arith.constant 0 : index
    %13 = vector.load %arg3[%c0_7, %c0_8] : memref<64x4xf32, #tpu.memory_space<vmem>>, vector<64x4xf32>
    %14 = vector.broadcast %12 : vector<1x4xf32> to vector<64x4xf32>
    %15 = arith.mulf %13, %14 : vector<64x4xf32>
    %cst_9 = arith.constant dense<0.000000e+00> : vector<64xf32>
    %16 = vector.multi_reduction <add>, %15, %cst_9 [1] : vector<64x4xf32> to vector<64xf32>
    %17 = vector.shape_cast %16 : vector<64xf32> to vector<64x1xf32>
    %18 = arith.negf %17 : vector<64x1xf32>
    %19 = math.exp %18 : vector<64x1xf32>
    %cst_10 = arith.constant 1.000000e+00 : f32
    %20 = vector.broadcast %cst_10 : f32 to vector<64x1xf32>
    %21 = arith.addf %20, %19 : vector<64x1xf32>
    %22 = arith.divf %20, %21 : vector<64x1xf32>
    %23 = vector.broadcast %22 : vector<64x1xf32> to vector<64x256xf32>
    %24 = arith.mulf %1, %23 : vector<64x256xf32>
    %c0_11 = arith.constant 0 : index
    %c0_12 = arith.constant 0 : index
    %c0_13 = arith.constant 0 : index
    %25 = vector.load %arg4[%c0_11, %c0_12, %c0_13] : memref<1x64x256xf32, #tpu.memory_space<vmem>>, vector<1x64x256xf32>
    %26 = vector.shape_cast %25 : vector<1x64x256xf32> to vector<64x256xf32>
    %27 = vector.shape_cast %24 : vector<64x256xf32> to vector<1x64x256xf32>
    tpu.vector_store %arg4[%c0_11, %c0_12, %c0_13], %27 {strides = array<i32>} : memref<1x64x256xf32, #tpu.memory_space<vmem>>, vector<1x64x256xf32>,
    return
  }
  func.func @transform_0(%arg0: i32) -> (i32, i32, i32) {
    %c0_i32 = arith.constant 0 : i32
    %c0_i32_0 = arith.constant 0 : i32
    %c0_i32_1 = arith.constant 0 : i32
    return %arg0, %c0_i32, %c0_i32_0 : i32, i32, i32
  }
  func.func @transform_1(%arg0: i32) -> (i32, i32) {
    %c0_i32 = arith.constant 0 : i32
    %c0_i32_0 = arith.constant 0 : i32
    %c0_i32_1 = arith.constant 0 : i32
    return %c0_i32, %c0_i32_0 : i32, i32
  }
  func.func @transform_2(%arg0: i32) -> (i32, i32) {
    %c0_i32 = arith.constant 0 : i32
    %c0_i32_0 = arith.constant 0 : i32
    %c0_i32_1 = arith.constant 0 : i32
    return %c0_i32, %c0_i32_0 : i32, i32
  }
  func.func @transform_3(%arg0: i32) -> (i32, i32, i32) {
    %c0_i32 = arith.constant 0 : i32
    %c0_i32_0 = arith.constant 0 : i32
    %c0_i32_1 = arith.constant 0 : i32
    return %arg0, %c0_i32, %c0_i32_0 : i32, i32, i32
  }
}

</mosaic_0001>

<bundles_post_ra>
// kernel: tpu_custom_call.1
= control target key start
LH: loop header
LB: loop body
LE: loop exit
PB: predicated region body
PF: predicated region fallthrough
CT: control target
= control target key end

     0   :  { %8 = vsyncpa [#allocation3], 0  ;;  %s1014_s0 = inlined_call_operand.hbm [shape: f32[2,64,256], index: 0, kind: input, shape index: {}]   ;;  %s1015_s1 = inlined_call_operand.vmem [shape: f32[64,4], index: 1, kind: input, shape index: {}]   ;;  %s1016_s2 = inlined_call_operand.vmem [shape: f32[64,4], index: 2, kind: input, shape index: {}]   ;;  %s1017_s3 = inlined_call_operand.hbm [shape: f32[2,64,256], index: 3, kind: output, shape index: {}]  }
   0x1   :  { %10 = vsyncpa [#allocation3 + $0x1], 0 }
   0x2   :  { %11 = vsyncpa [#allocation4], 0 }
   0x3   :  { %13 = vsyncpa [#allocation4 + $0x1], 0  ;;  %s709_s12 = smov 0   ;;  %s711_s13 = smov 0  }
   0x4   :  { %s713_s14 = smov 0   ;;  %s715_s15 = smov 0  }
   0x5 LB: > { %s730_s16 = sadd.s32 4294967295, %s681_s15   ;;  %s483_s17 = sadd.s32 4294967294, %s681_s15   ;;  %s681_s15 = sphi %s715_s15, %s1032_s15   ;;  %s677_s14 = sphi %s713_s14, %s1031_s14   ;;  %s673_s13 = sphi %s711_s13, %s1030_s13   ;;  %s669_s12 = sphi %s709_s12, %s1029_s12  }
   0x6   : > { %s734_s18 = sadd.s32 1, %s681_s15   ;;  %s26_s19 = sadd.s32 1, %s677_s14 }
   0x7   : > { %s23_s20 = ssub.s32 %s681_s15, %s734_s18  ;;  %p33_p0 = scmp.ne.s32.totalorder %s677_s14, %s673_s13 }
   0x8   : > { %p24_p1 = scmp.eq.s32.totalorder %s23_s20, 0  ;;  %p34_p2 = scmp.eq.s32.totalorder %s681_s15, 0 }
   0x9   : > { %p39_p3 = scmp.ne.s32.totalorder %s673_s13, %s669_s12  ;;  %p40_p4 = scmp.eq.s32.totalorder %s730_s16, 0 }
   0xa   : > { %s746_s21 = scalar_select %p24_p1, %s677_s14, %s26_s19  }
   0xb   : > { %p748_p5 = por %p34_p2, %p33_p0  ;;  %p752_p6 = por %p40_p4, %p39_p3 }
   0xc   : > { %p105_p7 = scmp.eq.s32.totalorder %s730_s16, 1  ;;  %p111_p8 = scmp.eq.s32.totalorder %s483_s17, 1 }
   0xd   : > { %s1021_s23 = scalar_select %p752_p6, 1, 0 }
   0xe   : > { %p519_p10 = scmp.lt.s32.totalorder %s681_s15, 2  ;;  %p759_p11 = por %p105_p7, %p33_p0 }
   0xf   : > { %p763_p12 = por %p111_p8, %p39_p3  ;;  %s137_s26 = sand.u32 1, %s677_s14  }
  0x10   : > { %s1022_s24 = scalar_select %p759_p11, 1, 0 }
  0x11   : > { %s1023_s25 = scalar_select %p763_p12, 1, 0 }
  0x12   : > { %s505_s27 = sshll.u32 %s681_s15, 11  ;;  %s486_s28 = sshll.u32 %s137_s26, 7 }
  0x13   : > { %s772_s4 = scalar_lea.hbm %s1014_s0, %s505_s27  ;;  %s141_s5 = scalar_lea.vmem [#allocation2], %s486_s28 }
  0x14   : > { %s148_s6 = sshll.u32 %s141_s5, 4  ;;  %p776_p13 = pnand %p519_p10, %p748_p5  ;;  %s780_s6 = int_to_ptr.vmem [resolvable:$true] %s148_s6 }
  0x15   : > { %s782_s8 = scalar_lea.sflag [#allocation3], %s137_s26  ;;  %s589_s9 = scalar_lea.hbm %s772_s4, 2048 }
  0x16   : > { %p590_p0 = scmp.ne.s32.totalorder %s772_s4, %s589_s9  ;;  %p591_p1 = pneg %p776_p13 }
  0x17   : > { %s594_s17 = scalar_lea.hbm %s1014_s0, 4096  ;;  %p595_p4 = scmp.lt.s32.totalorder %s772_s4, %s1014_s0 }
  0x18   : > { %p592_p2 = pnand %p591_p1, %p590_p0  ;;  %p596_p5 = scmp.lt.s32.totalorder %s594_s17, %s589_s9 }
  0x1a   : > { %p593_p3 = pneg %p592_p2  ;;  %p597_p7 = por %p596_p5, %p595_p4 }
  0x1c   : > { %p598_p8 = pnand %p597_p7, %p593_p3 }
  0x1e   : > { %601 = shalt.err (!%p598_p8)
}
  0x1f   : > { %s602_s22 = scalar_lea.vmem %s780_s6, 2048  ;;  %s683_s26 = smov [#allocation2]  }
  0x20   : > { %p603_p10 = scmp.ne.s32.totalorder %s780_s6, %s602_s22  ;;  %s607_s27 = sshll.u32 %s683_s26, 4  ;;  %s608_s27 = int_to_ptr.vmem [resolvable:$false] %s607_s27 }
  0x21   : > { %s609_s28 = scalar_lea.vmem %s608_s27, 4096  ;;  %p610_p2 = scmp.lt.s32.totalorder %s780_s6, %s608_s27 }
  0x22   : > { %p605_p9 = pnand %p603_p10, %p591_p1  ;;  %p611_p12 = scmp.lt.s32.totalorder %s609_s28, %s602_s22 }
  0x24   : > { %p606_p0 = pneg %p605_p9  ;;  %p612_p11 = por %p611_p12, %p610_p2 }
  0x26   : > { %p613_p6 = pnand %p612_p11, %p606_p0 }
  0x28   : > { %616 = shalt.err (!%p613_p6)
}
  0x29   : > { %s684_s29 = smov 256   ;;  %s685_s30 = smov 16  }
  0x2a   : > { %514 = dma.hbm_to_vmem [thread:$0]  (!%p776_p13), %s772_s4, 2048, %s780_s6, %s782_s8, %s684_s29, %s684_s29, %s685_s30  }
  0x2b   : > { %p489_p9 = scmp.ge.s32.totalorder %s681_s15, 1  ;;  %p156_p1 = scmp.lt.s32.totalorder %s681_s15, 3 }
  0x2d   : > { %p157_p3 = pnand %p489_p9, %p156_p1 }
  0x2e   : > { %s806_s5 = sand.u32 (!%p157_p3), 1, %s673_s13   ;;  %p1025_p6 = scmp.ne.s32.totalorder (!%p157_p3), %s1021_s23, 0 }
  0x2f   : > { %160 = sbr.rel (%p157_p3) target bundleno = 433 (0x1b1), region = 32  ;;  %s490_s9 = sshll.u32 (!%p157_p3), %s806_s5, 7 }
  0x30   : > { %s163_s10 = scalar_lea.sflag (!%p157_p3), [#allocation3], %s806_s5  ;;  %s166_s11 = scalar_lea.vmem (!%p157_p3), [#allocation2], %s490_s9 }
  0x34   : > { %660 = dma.done.wait (%p1025_p6), %s163_s10, 2048  }
  0x35   : > { %662 = vsyncadd (%p1025_p6), %s163_s10, 4294965248  ;;  %v816_v0 = vld [vmem:[%s166_s11] sm:$0xff]  ;;  %v818_v1 = vld [vmem:[%s166_s11 + $0x8] sm:$0xff]  ;;  %vm253_vm0 = vcmask 31744   ;;  %s934_s23 = scalar_lea.vmem [#allocation5], %s490_s9  ;;  %s506_s9 = sshll.u32 %s730_s16, 11 }
  0x36   : > { %v820_v2 = vld [vmem:[%s166_s11 + $0x20] sm:$0xff]  ;;  %v205_v3 = vadd.f32 %v818_v1, %v816_v0  ;;  %v824_v4 = vld [vmem:[%s166_s11 + $0x28] sm:$0xff]  ;;  %v826_v5 = vld [vmem:[%s166_s11 + $0x10] sm:$0xff]  ;;  %s410_s4 = sshll.u32 %s934_s23, 4  ;;  %s963_s8 = scalar_lea.hbm %s1017_s3, %s506_s9  ;;  %s965_s4 = int_to_ptr.vmem [resolvable:$true] %s410_s4 }
  0x37   : > { %v828_v6 = vld [vmem:[%s166_s11 + $0x18] sm:$0xff]  ;;  %v211_v7 = vadd.f32 %v824_v4, %v820_v2  ;;  %v832_v8 = vld [vmem:[%s166_s11 + $0x30] sm:$0xff]  ;;  %v840_v12 = vld [vmem:[%s166_s11 + $0x40] sm:$0xff]  ;;  %s397_s16 = scalar_lea.sflag [#allocation4], %s806_s5  ;;  %s617_s17 = scalar_lea.vmem %s965_s4, 2048 }
  0x38   : > { %v834_v9 = vld [vmem:[%s166_s11 + $0x38] sm:$0xff]  ;;  %206 = vadd.xlane.f32.xlu0 %v205_v3  ;;  %v208_v10 = vadd.f32 %v828_v6, %v826_v5  ;;  %v842_v13 = vld [vmem:[%s166_s11 + $0x48] sm:$0xff]  ;;  %v844_v14 = vld [vmem:[%s166_s11 + $0x50] sm:$0xff]  ;;  %p618_p11 = scmp.ne.s32.totalorder %s965_s4, %s617_s17  ;;  %p1026_p12 = scmp.ne.s32.totalorder %s1022_s24, 0 }
  0x39   : > { %212 = vadd.xlane.f32.xlu1 %v211_v7  ;;  %v214_v11 = vadd.f32 %v834_v9, %v832_v8  ;;  %v846_v15 = vld [vmem:[%s166_s11 + $0x58] sm:$0xff]  ;;  %v217_v16 = vadd.f32 %v842_v13, %v840_v12  ;;  %v852_v18 = vld [vmem:[%s166_s11 + $0x60] sm:$0xff]  ;;  %v854_v19 = vld [vmem:[%s166_s11 + $0x68] sm:$0xff]  ;;  %s686_s19 = smov [#allocation5]  }
  0x3a   : > { %v220_v17 = vadd.f32 %v846_v15, %v844_v14  ;;  %v856_v20 = vld [vmem:[%s166_s11 + $0x70] sm:$0xff]  ;;  %v858_v21 = vld [vmem:[%s166_s11 + $0x78] sm:$0xff]  ;;  %v223_v22 = vadd.f32 %v854_v19, %v852_v18  ;;  %v237_v27 = vld [vmem:[%s1015_s1] sm:$0xff]  ;;  %p619_p13 = pnand %p618_p11, %p1026_p12  ;;  %s621_s20 = sshll.u32 %s686_s19, 4  ;;  %s622_s20 = int_to_ptr.vmem [resolvable:$false] %s621_s20 }
  0x3b   : > { %v226_v23 = vadd.f32 %v858_v21, %v856_v20  ;;  %v239_v29 = vld [vmem:[%s1015_s1 + $0x10] sm:$0xff]  ;;  %v238_v30 = vld [vmem:[%s1015_s1 + $0x8] sm:$0xff]  ;;  %v240_v34 = vld [vmem:[%s1015_s1 + $0x18] sm:$0xff]  ;;  %s623_s22 = scalar_lea.vmem %s622_s20, 4096  ;;  %p624_p5 = scmp.lt.s32.totalorder %s965_s4, %s622_s20 }
  0x3c   : > { %209 = vadd.xlane.f32.xlu0 %v208_v10  ;;  %v241_v40 = vld [vmem:[%s1015_s1 + $0x20] sm:$0xff]  ;;  %v242_v45 = vld [vmem:[%s1015_s1 + $0x28] sm:$0xff]  ;;  %v243_v54 = vld [vmem:[%s1015_s1 + $0x30] sm:$0xff]  ;;  %p620_p4 = pneg %p619_p13  ;;  %p625_p7 = scmp.lt.s32.totalorder %s623_s22, %s617_s17 }
  0x3d   : > { %215 = vadd.xlane.f32.xlu1 %v214_v11  ;;  %v244_v58 = vld [vmem:[%s1015_s1 + $0x38] sm:$0xff] }
  0x3e   : > { %p626_p8 = por %p625_p7, %p624_p5 }
  0x40   : > { %218 = vadd.xlane.f32.xlu0 %v217_v16  ;;  %p627_p10 = pnand %p626_p8, %p620_p4 }
  0x41   : > { %221 = vadd.xlane.f32.xlu1 %v220_v17 }
  0x44   : > { %224 = vadd.xlane.f32.xlu0 %v223_v22 }
  0x45   : > { %227 = vadd.xlane.f32.xlu1 %v226_v23 }
  0xc1   : > { %v207_v24 = vpop.xlane.xlu0 %206 }
  0xc2   : > { %v229_v25 = vmul.f32 0.00390625, %v207_v24  ;;  %v213_v26 = vpop.xlane.xlu1 %212 }
  0xc3   : > { %v231_v28 = vmul.f32 0.00390625, %v213_v26 }
  0xc4   : > { %v245_v32 = vmul.f32 %v237_v27, %v229_v25 }
  0xc5   : > { %v210_v31 = vpop.xlane.xlu0 %209  ;;  %v247_v37 = vmul.f32 %v239_v29, %v231_v28  ;;  %v277_v29 = vld [vmem:[%s1016_s2 + $0x8] sm:$0xff] }
  0xc6   : > { %v230_v33 = vmul.f32 0.00390625, %v210_v31  ;;  %v216_v35 = vpop.xlane.xlu1 %215  ;;  %v254_v42 = vsel %vm253_vm0, %v245_v32, 0.0  ;;  %v279_v32 = vld [vmem:[%s1016_s2 + $0x18] sm:$0xff] }
  0xc7   : > { %v232_v36 = vmul.f32 0.00390625, %v216_v35  ;;  %v257_v49 = vsel %vm253_vm0, %v247_v37, 0.0 }
  0xc8   : > { %v246_v38 = vmul.f32 %v238_v30, %v230_v33  ;;  %v276_v30 = vld [vmem:[%s1016_s2] sm:$0xff]  ;;  %v278_v33 = vld [vmem:[%s1016_s2 + $0x10] sm:$0xff] }
  0xc9   : > { %v248_v39 = vmul.f32 %v240_v34, %v232_v36  ;;  %v219_v41 = vpop.xlane.xlu0 %218 }
  0xca   : > { %v255_v43 = vsel %vm253_vm0, %v246_v38, 0.0  ;;  %v233_v44 = vmul.f32 0.00390625, %v219_v41  ;;  %v222_v46 = vpop.xlane.xlu1 %221  ;;  %v280_v41 = vld [vmem:[%s1016_s2 + $0x20] sm:$0xff] }
  0xcb   : > { %v256_v47 = vadd.f32 %v255_v43, %v254_v42  ;;  %v234_v48 = vmul.f32 0.00390625, %v222_v46  ;;  %v259_v50 = vsel %vm253_vm0, %v248_v39, 0.0  ;;  %v283_v46 = vld [vmem:[%s1016_s2 + $0x38] sm:$0xff] }
  0xcc   : > { %v249_v51 = vmul.f32 %v241_v40, %v233_v44  ;;  %v281_v40 = vld [vmem:[%s1016_s2 + $0x28] sm:$0xff] }
  0xcd   : > { %v258_v52 = vadd.f32 %v257_v49, %v256_v47  ;;  %v250_v53 = vmul.f32 %v242_v45, %v234_v48  ;;  %v225_v55 = vpop.xlane.xlu0 %224  ;;  %v282_v47 = vld [vmem:[%s1016_s2 + $0x30] sm:$0xff] }
  0xce   : > { %v261_v56 = vsel %vm253_vm0, %v249_v51, 0.0  ;;  %v235_v57 = vmul.f32 0.00390625, %v225_v55  ;;  %v228_v59 = vpop.xlane.xlu1 %227 }
  0xcf   : > { %v260_v60 = vadd.f32 %v259_v50, %v258_v52  ;;  %v236_v61 = vmul.f32 0.00390625, %v228_v59  ;;  %v263_v62 = vsel %vm253_vm0, %v250_v53, 0.0 }
  0xd0   : > { %v251_v63 = vmul.f32 %v243_v54, %v235_v57 }
  0xd1   : > { %v262_v3 = vadd.f32 %v261_v56, %v260_v60  ;;  %v252_v7 = vmul.f32 %v244_v58, %v236_v61 }
  0xd2   : > { %v265_v10 = vsel %vm253_vm0, %v251_v63, 0.0 }
  0xd3   : > { %v264_v11 = vadd.f32 %v263_v62, %v262_v3  ;;  %v267_v16 = vsel %vm253_vm0, %v252_v7, 0.0 }
  0xd5   : > { %v266_v17 = vadd.f32 %v265_v10, %v264_v11 }
  0xd7   : > { %v268_v22 = vadd.f32 %v267_v16, %v266_v17 }
  0xd9   : > { %v269_v23 = vrot.slane %v268_v22, 4 }
  0xdb   : > { %v270_v24 = vadd.f32 %v269_v23, %v268_v22 }
  0xdd   : > { %v271_v25 = vrot.slane %v270_v24, 2 }
  0xdf   : > { %v272_v26 = vadd.f32 %v271_v25, %v270_v24 }
  0xe1   : > { %v273_v27 = vrot.slane %v272_v26, 1 }
  0xe3   : > { %v274_v28 = vadd.f32 %v273_v27, %v272_v26 }
  0xe5   : > { %v275_v31 = vmax.f32 %v274_v28, 0.0 }
  0xe7   : > { %v285_v34 = vmul.f32 %v277_v29, %v275_v31  ;;  %v284_v35 = vmul.f32 %v276_v30, %v275_v31  ;;  %v287_v38 = vmul.f32 %v279_v32, %v275_v31  ;;  %v286_v39 = vmul.f32 %v278_v33, %v275_v31 }
  0xe8   : > { %v289_v44 = vmul.f32 %v281_v40, %v275_v31  ;;  %v288_v45 = vmul.f32 %v280_v41, %v275_v31  ;;  %v291_v50 = vmul.f32 %v283_v46, %v275_v31  ;;  %v290_v51 = vmul.f32 %v282_v47, %v275_v31 }
  0xe9   : > { %v295_v36 = vsel %vm253_vm0, %v285_v34, 0.0  ;;  %v292_v37 = vsel %vm253_vm0, %v284_v35, 0.0  ;;  %v301_v42 = vsel %vm253_vm0, %v287_v38, 0.0  ;;  %v298_v43 = vsel %vm253_vm0, %v286_v39, 0.0 }
  0xea   : > { %296 = vadd.xlane.f32.xlu1 %v295_v36  ;;  %293 = vadd.xlane.f32.xlu0 %v292_v37  ;;  %v307_v48 = vsel %vm253_vm0, %v289_v44, 0.0  ;;  %v304_v49 = vsel %vm253_vm0, %v288_v45, 0.0  ;;  %v313_v52 = vsel %vm253_vm0, %v291_v50, 0.0  ;;  %v310_v53 = vsel %vm253_vm0, %v290_v51, 0.0 }
  0xee   : > { %302 = vadd.xlane.f32.xlu1 %v301_v42  ;;  %299 = vadd.xlane.f32.xlu0 %v298_v43 }
  0xf2   : > { %308 = vadd.xlane.f32.xlu1 %v307_v48  ;;  %305 = vadd.xlane.f32.xlu0 %v304_v49 }
  0xf6   : > { %314 = vadd.xlane.f32.xlu1 %v313_v52  ;;  %311 = vadd.xlane.f32.xlu0 %v310_v53 }
 0x173   : > { %v297_v54 = vpop.xlane.xlu1 %296  ;;  %v294_v55 = vpop.xlane.xlu0 %293 }
 0x174   : > { %v493_v56 = vmul.f32 -1.442695, %v297_v54  ;;  %v492_v57 = vmul.f32 -1.442695, %v294_v55 }
 0x176   : > { %557 = vpow2.f32 %v493_v56 }
 0x177   : > { %559 = vpow2.f32 %v492_v57  ;;  %v303_v58 = vpop.xlane.xlu1 %302  ;;  %v300_v59 = vpop.xlane.xlu0 %299 }
 0x178   : > { %v495_v60 = vmul.f32 -1.442695, %v303_v58  ;;  %v494_v61 = vmul.f32 -1.442695, %v300_v59 }
 0x17a   : > { %561 = vpow2.f32 %v495_v60 }
 0x17b   : > { %563 = vpow2.f32 %v494_v61  ;;  %v309_v62 = vpop.xlane.xlu1 %308  ;;  %v306_v63 = vpop.xlane.xlu0 %305 }
 0x17c   : > { %v497_v3 = vmul.f32 -1.442695, %v309_v62  ;;  %v496_v7 = vmul.f32 -1.442695, %v306_v63 }
 0x17e   : > { %565 = vpow2.f32 %v497_v3 }
 0x17f   : > { %567 = vpow2.f32 %v496_v7  ;;  %v315_v10 = vpop.xlane.xlu1 %314  ;;  %v312_v11 = vpop.xlane.xlu0 %311 }
 0x180   : > { %v499_v16 = vmul.f32 -1.442695, %v315_v10  ;;  %v498_v17 = vmul.f32 -1.442695, %v312_v11 }
 0x182   : > { %569 = vpow2.f32 %v499_v16 }
 0x183   : > { %v558_v22 = vpop.eup %557  ;;  %571 = vpow2.f32 %v498_v17 }
 0x184   : > { %v560_v23 = vpop.eup %559  ;;  %v341_v24 = vadd.f32 1.0, %v558_v22 }
 0x185   : > { %v340_v25 = vadd.f32 1.0, %v560_v23 }
 0x186   : > { %573 = vrcp.f32 %v341_v24 }
 0x187   : > { %v562_v26 = vpop.eup %561  ;;  %575 = vrcp.f32 %v340_v25 }
 0x188   : > { %v564_v27 = vpop.eup %563  ;;  %v343_v28 = vadd.f32 1.0, %v562_v26 }
 0x189   : > { %v342_v29 = vadd.f32 1.0, %v564_v27 }
 0x18a   : > { %577 = vrcp.f32 %v343_v28 }
 0x18b   : > { %v566_v30 = vpop.eup %565  ;;  %579 = vrcp.f32 %v342_v29 }
 0x18c   : > { %v568_v31 = vpop.eup %567  ;;  %v345_v32 = vadd.f32 1.0, %v566_v30 }
 0x18d   : > { %v344_v33 = vadd.f32 1.0, %v568_v31 }
 0x18e   : > { %581 = vrcp.f32 %v345_v32 }
 0x18f   : > { %v570_v34 = vpop.eup %569  ;;  %583 = vrcp.f32 %v344_v33 }
 0x190   : > { %v572_v35 = vpop.eup %571  ;;  %v347_v36 = vadd.f32 1.0, %v570_v34 }
 0x191   : > { %v346_v37 = vadd.f32 1.0, %v572_v35 }
 0x192   : > { %585 = vrcp.f32 %v347_v36 }
 0x193   : > { %v574_v38 = vpop.eup %573  ;;  %587 = vrcp.f32 %v346_v37 }
 0x194   : > { %v576_v39 = vpop.eup %575  ;;  %v366_v40 = vmul.f32 %v574_v38, %v826_v5  ;;  %v367_v41 = vmul.f32 %v574_v38, %v828_v6 }
 0x195   : > { %v364_v42 = vmul.f32 %v576_v39, %v816_v0  ;;  %v365_v43 = vmul.f32 %v576_v39, %v818_v1 }
 0x196   : > { %382 = vst [vmem:[%s934_s23 + $0x10] sm:$0xff] %v366_v40  ;;  %383 = vst [vmem:[%s934_s23 + $0x18] sm:$0xff] %v367_v41 }
 0x197   : > { %v578_v5 = vpop.eup %577  ;;  %380 = vst [vmem:[%s934_s23] sm:$0xff] %v364_v42  ;;  %381 = vst [vmem:[%s934_s23 + $0x8] sm:$0xff] %v365_v43 }
 0x198   : > { %v580_v0 = vpop.eup %579  ;;  %v370_v1 = vmul.f32 %v578_v5, %v832_v8  ;;  %v371_v6 = vmul.f32 %v578_v5, %v834_v9 }
 0x199   : > { %v368_v44 = vmul.f32 %v580_v0, %v820_v2  ;;  %v369_v45 = vmul.f32 %v580_v0, %v824_v4 }
 0x19a   : > { %386 = vst [vmem:[%s934_s23 + $0x30] sm:$0xff] %v370_v1  ;;  %387 = vst [vmem:[%s934_s23 + $0x38] sm:$0xff] %v371_v6 }
 0x19b   : > { %v582_v46 = vpop.eup %581  ;;  %384 = vst [vmem:[%s934_s23 + $0x20] sm:$0xff] %v368_v44  ;;  %385 = vst [vmem:[%s934_s23 + $0x28] sm:$0xff] %v369_v45 }
 0x19c   : > { %v584_v47 = vpop.eup %583  ;;  %v374_v48 = vmul.f32 %v582_v46, %v844_v14  ;;  %v375_v8 = vmul.f32 %v582_v46, %v846_v15 }
 0x19d   : > { %v372_v49 = vmul.f32 %v584_v47, %v840_v12  ;;  %v373_v9 = vmul.f32 %v584_v47, %v842_v13 }
 0x19e   : > { %390 = vst [vmem:[%s934_s23 + $0x50] sm:$0xff] %v374_v48  ;;  %391 = vst [vmem:[%s934_s23 + $0x58] sm:$0xff] %v375_v8 }
 0x19f   : > { %v586_v2 = vpop.eup %585  ;;  %388 = vst [vmem:[%s934_s23 + $0x40] sm:$0xff] %v372_v49  ;;  %389 = vst [vmem:[%s934_s23 + $0x48] sm:$0xff] %v373_v9 }
 0x1a0   : > { %v588_v4 = vpop.eup %587  ;;  %v378_v14 = vmul.f32 %v586_v2, %v856_v20  ;;  %v379_v12 = vmul.f32 %v586_v2, %v858_v21 }
 0x1a1   : > { %v376_v13 = vmul.f32 %v588_v4, %v852_v18  ;;  %v377_v15 = vmul.f32 %v588_v4, %v854_v19 }
 0x1a2   : > { %394 = vst [vmem:[%s934_s23 + $0x70] sm:$0xff] %v378_v14  ;;  %395 = vst [vmem:[%s934_s23 + $0x78] sm:$0xff] %v379_v12 }
 0x1a3   : > { %392 = vst [vmem:[%s934_s23 + $0x60] sm:$0xff] %v376_v13  ;;  %393 = vst [vmem:[%s934_s23 + $0x68] sm:$0xff] %v377_v15 }
 0x1a4   : > { %630 = shalt.err (!%p627_p10)
}
 0x1a5   : > { %s631_s26 = scalar_lea.hbm %s963_s8, 2048  ;;  %s635_s29 = scalar_lea.hbm %s1017_s3, 4096 }
 0x1a6   : > { %p632_p0 = scmp.ne.s32.totalorder %s963_s8, %s631_s26  ;;  %p636_p1 = scmp.lt.s32.totalorder %s963_s8, %s1017_s3 }
 0x1a7   : > { %p637_p3 = scmp.lt.s32.totalorder %s635_s29, %s631_s26 }
 0x1a8   : > { %p633_p2 = pnand %p632_p0, %p1026_p12 }
 0x1a9   : > { %p638_p6 = por %p637_p3, %p636_p1 }
 0x1aa   : > { %p634_p9 = pneg %p633_p2 }
 0x1ac   : > { %p639_p11 = pnand %p638_p6, %p634_p9 }
 0x1ae   : > { %642 = shalt.err (!%p639_p11)
}
 0x1af   : > { %s687_s11 = smov 256   ;;  %s688_s23 = smov 16  }
 0x1b0   : > { %509 = dma.vmem_to_hbm [thread:$0]  (%p1026_p12), %s965_s4, 2048, %s963_s8, %s397_s16, %s687_s11, %s687_s11, %s688_s23  }
 0x1b1 PF: > { %s425_s9 = sand.u32 1, %s669_s12   ;;  %p1027_p13 = scmp.ne.s32.totalorder %s1023_s25, 0 }
 0x1b2   : > { %p1028_p4 = scmp.ge.s32.totalorder %s681_s15, 2  ;;  %s426_s6 = scalar_lea.sflag [#allocation4], %s425_s9 }
 0x1b4   : > { %p516_p5 = pnand %p1028_p4, %p1027_p13 }
 0x1b6   : > { %p517_p7 = pneg %p516_p5 }
 0x1b8   : > { %664 = dma.done.wait (%p517_p7), %s426_s6, 2048  }
 0x1b9   : > { %666 = vsyncadd (%p517_p7), %s426_s6, 4294965248  ;;  %p16_p8 = scmp.ge.s32.totalorder %s734_s18, 4   ;;  %s1029_s12 = smov %s673_s13 }
 0x1ba   : > { %s1030_s13 = smov %s677_s14  ;;  %s1031_s14 = smov %s746_s21 }
 0x1bb   : > { %s1032_s15 = smov %s734_s18  ;;  %18 = sbr.rel (!%p16_p8) target bundleno = 5 (0x5), region = 77 }
 0x1c0   :  { %431 = vsyncpa [#allocation3], 1 }
 0x1c1   :  { %433 = vsyncpa [#allocation3 + $0x1], 1 }
 0x1c2   :  { %434 = vsyncpa [#allocation4], 1 }
 0x1c3   :  { %436 = vsyncpa [#allocation4 + $0x1], 1 }

</bundles_post_ra>
